<compile_context>
chip_gen: v7x
topology: tpu7x:2x2x1
jax: 0.10.0
libtpu: 0.0.40
codegen_flags: <defaults>
</compile_context>

<pallas_src>
import functools
import inspect
import math
from collections.abc import Iterable

import jax
import jax.numpy as jnp
from jax.experimental import pallas as pl
from jax.experimental.pallas import tpu as pltpu

N_QUBITS = 16   # circuit width (= features per sample)
LANES = 128     # lane-dense padding of the output / theta_T column axis
BATCH = 4


def _round_up(x: int, m: int) -> int:
    return (x + m - 1) // m * m


# ----------------------------- Pallas kernel ------------------------------ #
def _circuit_kernel(x_ref, theta_t_ref, phi_ref, o_ref):
    # x_ref:       (tile_m, 16)  VMEM -- unpadded input angles (full last dim)
    # theta_t_ref: (16, 128)     VMEM -- theta^T, zero-padded on lanes 16..127
    # phi_ref:     (1,)          SMEM -- scalar phase offset (scalar path)
    # o_ref:       (tile_m, 128) VMEM -- lane-dense output (unmasked stores)
    c = jnp.cos(x_ref[...])                                  # VPU/EUP
    # out[m, j] = sum_k cos(x)[m, k] * theta[j, k]  (theta_T[k, j] = theta[j, k])
    z = jax.lax.dot_general(                                 # MXU
        c, theta_t_ref[...],
        dimension_numbers=(((1,), (0,)), ((), ())),
        preferred_element_type=jnp.float32,
        precision=jax.lax.Precision.HIGHEST,
    )
    # Padded lanes j>=16 get tanh(phi) but are sliced off by the caller.
    o_ref[...] = jnp.tanh(z + phi_ref[0])                    # EUP


def _prepare_theta(theta):
    """(N, N) theta -> theta^T zero-padded to (N, LANES).

    Invariant: padded columns (output lanes >= N_QUBITS) are zero, so the
    padded output lanes carry no real contribution and are sliced away.
    Inside the layer's jitted forward theta is a compile-time constant, so
    this pad/transpose constant-folds instead of running per call.
    """
    th = jnp.asarray(theta, jnp.float32)
    return jnp.zeros((N_QUBITS, LANES), jnp.float32).at[:, :N_QUBITS].set(th.T)


def _circuit_pallas(x2, theta_t, phi):
    """Batched evaluation: x2 (M, N_QUBITS), theta_t (N_QUBITS, LANES)."""
    m, n = x2.shape
    assert n == N_QUBITS and theta_t.shape == (N_QUBITS, LANES)

    # 8-row floor for tiny batches; 512-row tiles for big batches so each grid
    # step moves enough bytes to hide the ~0.35 us per-step overhead.  Once
    # m_pad >= 1024 the grid has >= 2 steps, letting "parallel" shard the M
    # axis across v7x's two TensorCores (harmless single-TC on v5e/v6e).
    tile_m = min(512, _round_up(m, 8))
    m_pad = _round_up(m, tile_m)
    if m_pad != m:
        # Row-only padding; padded rows produce garbage that is sliced away.
        x2 = jnp.zeros((m_pad, n), jnp.float32).at[:m].set(x2)

    phi1 = jnp.reshape(phi, (1,)).astype(jnp.float32)

    out = pl.pallas_call(
        _circuit_kernel,
        out_shape=jax.ShapeDtypeStruct((m_pad, LANES), jnp.float32),
        grid=(m_pad // tile_m,),
        in_specs=[
            # x: unpadded last dim (16 == full array dim) -> 8x less input DMA.
            pl.BlockSpec((tile_m, N_QUBITS), lambda i: (i, 0)),
            # theta_T: constant block index -> DMA'd once, resident across steps.
            pl.BlockSpec((N_QUBITS, LANES), lambda i: (0, 0)),
            # phi: scalar path, no VMEM tile / DMA.
            pl.BlockSpec(memory_space=pltpu.MemorySpace.SMEM),
        ],
        out_specs=pl.BlockSpec((tile_m, LANES), lambda i: (i, 0)),
        compiler_params=pltpu.CompilerParams(
            dimension_semantics=("parallel",)),
    )(x2, theta_t, phi1)

    return out[:m, :N_QUBITS]


def circuit(inputs, theta, phi):
    """Synthetic quantum-circuit surrogate: tanh(theta @ cos(inputs) + phi).

    Accepts a single (N,) angle vector or a (B, N) batch; all rows are
    evaluated by a single Pallas call.  Plain-traceable so it can be fused
    into a caller's jit (TorchLayerJAX.forward) or jitted standalone.
    """
    x = jnp.asarray(inputs, jnp.float32)
    squeeze = x.ndim == 1
    x2 = x.reshape(1, N_QUBITS) if squeeze else x
    out = _circuit_pallas(x2, _prepare_theta(theta),
                          jnp.asarray(phi, jnp.float32))
    return out[0] if squeeze else out


# Whole user-facing batched path in one compiled program.
circuit_jit = jax.jit(circuit)


# --------------------------- TorchLayer in JAX ----------------------------- #
class TorchLayerJAX:
    """JAX re-implementation of pyqpanda TorchLayer forward semantics."""

    _input_arg = "inputs"

    def __init__(self, func, weight_shapes: dict, init_method=None, *, key=None):
        self.func = func
        weight_shapes = {
            w: tuple(s) if isinstance(s, Iterable) else (s,) if s > 1 else ()
            for w, s in weight_shapes.items()
        }
        self._signature_validation(func, weight_shapes)

        if key is None:
            key = jax.random.PRNGKey(0)
        if init_method is None:
            # torch.nn.init.uniform_(t, b=2*pi)  ->  U[0, 2*pi)
            init_method = functools.partial(
                jax.random.uniform, minval=0.0, maxval=2.0 * math.pi
            )

        self.qweight = {}
        for name, size in weight_shapes.items():
            key, sub = jax.random.split(key)
            if len(size) == 0:
                self.qweight[name] = init_method(sub, (1,), jnp.float32)[0]  # scalar
            else:
                self.qweight[name] = init_method(sub, size, jnp.float32)

        # One jitted program for the whole forward: slice + circuit (incl. the
        # Pallas call) + stack.  Weights are closed over as compile-time
        # constants so any weight prep (theta transpose/pad) constant-folds.
        def _forward_impl(inputs):
            if inputs.ndim > 1:
                reconstructor = []
                # torch.unbind(inputs)[ndim-1]: slice at index ndim-1 along dim 0
                # (faithful to the original; raises just like torch if the batch
                # is too small).
                x = inputs[inputs.ndim - 1]
                reconstructor.append(self._evaluate_qnode(x))
                return jnp.stack(reconstructor)
            return self._evaluate_qnode(inputs)

        self._forward = jax.jit(_forward_impl)

    def _signature_validation(self, func, weight_shapes):
        sig = inspect.signature(func).parameters
        if self.input_arg not in sig:
            raise TypeError(
                "Circuit must include an argument with name "
                f"{self.input_arg} for inputting data"
            )
        if self.input_arg in set(weight_shapes.keys()):
            raise ValueError(
                f"{self.input_arg} argument should not have its dimension "
                "specified in weight_shapes"
            )
        param_kinds = [p.kind for p in sig.values()]
        if inspect.Parameter.VAR_POSITIONAL in param_kinds:
            raise TypeError("Cannot have a variable number of positional arguments")
        if inspect.Parameter.VAR_KEYWORD not in param_kinds:
            if set(weight_shapes.keys()) | {self.input_arg} != set(sig.keys()):
                raise ValueError(
                    "Must specify a shape for every non-input parameter in the Circuit"
                )

    @property
    def input_arg(self):
        return self._input_arg

    def _evaluate_qnode(self, x):
        # TODO(synk): TorchModel.apply (custom autograd bridge) has no Pallas
        # equivalent; only the forward evaluation of `func` is reproduced.
        kwargs = {
            self.input_arg: x,
            **{arg: jnp.asarray(w, x.dtype) for arg, w in self.qweight.items()},
        }
        return self.func(**kwargs)

    def forward(self, inputs):
        return self._forward(jnp.asarray(inputs))


# ---------------------------------- main ----------------------------------- #
if __name__ == "__main__":
    key = jax.random.PRNGKey(0)
    k_in, k_w, k_big = jax.random.split(key, 3)

    # Batched inputs: (B, N) angle vectors.
    inputs = jax.random.uniform(
        k_in, (BATCH, N_QUBITS), dtype=jnp.float32, minval=0.0, maxval=2.0 * math.pi
    )

    layer = TorchLayerJAX(
        circuit,
        weight_shapes={"theta": (N_QUBITS, N_QUBITS), "phi": 1},  # phi -> scalar ()
        key=k_w,
    )
    theta = layer.qweight["theta"]
    phi = layer.qweight["phi"]

    # --- TorchLayer-faithful forward: evaluates the single slice inputs[ndim-1].
    out = jax.block_until_ready(layer.forward(inputs))   # shape (1, N_QUBITS)
    x_sel = inputs[inputs.ndim - 1]
    ref = jnp.tanh(theta @ jnp.cos(x_sel) + phi)[None, :]
    assert out.shape == (1, N_QUBITS), out.shape
    assert jnp.allclose(out, ref, atol=1e-5, rtol=1e-5), "forward mismatch vs reference"

    # --- Batched circuit path: all B rows through ONE pallas_call (one jit).
    out_b = jax.block_until_ready(circuit_jit(inputs, theta=theta, phi=phi))
    ref_b = jnp.tanh(jnp.cos(inputs) @ theta.T + phi)
    assert out_b.shape == (BATCH, N_QUBITS), out_b.shape
    assert jnp.allclose(out_b, ref_b, atol=1e-5, rtol=1e-5), "batched mismatch vs reference"

    # --- Multi-tile grid path (tile_m=512, grid=2, row padding exercised).
    big = jax.random.uniform(
        k_big, (520, N_QUBITS), dtype=jnp.float32, minval=0.0, maxval=2.0 * math.pi
    )
    out_big = jax.block_until_ready(circuit_jit(big, theta=theta, phi=phi))
    ref_big = jnp.tanh(jnp.cos(big) @ theta.T + phi)
    assert out_big.shape == (520, N_QUBITS), out_big.shape
    assert jnp.allclose(out_big, ref_big, atol=1e-5, rtol=1e-5), "large-batch mismatch"

    print("KERNEL_OK")
</pallas_src>

<mosaic_0001>
module attributes {stable_mosaic.version = 11 : i64} {
  func.func @_circuit_kernel(%arg0: i32, %arg1: memref<8x16xf32, #tpu.memory_space<vmem>>, %arg2: memref<16x128xf32, #tpu.memory_space<vmem>>, %arg3: memref<1xf32, #tpu.memory_space<smem>>, %arg4: memref<8x128xf32, #tpu.memory_space<vmem>>) attributes {dimension_semantics = [#tpu.dimension_semantics<parallel>], iteration_bounds = array<i64: 1>, scalar_prefetch = 0 : i64, scratch_operands = 0 : i64, tpu.core_type = #tpu.core_type<tc>, window_params = [{transform_indices = @transform_0, window_bounds = array<i64: 8, 16>}, {pipeline_mode = #tpu.pipeline_mode<synchronous>, transform_indices = @transform_1, window_bounds = array<i64: 16, 128>}, {transform_indices = @transform_2, window_bounds = array<i64: 1>}, {transform_indices = @transform_3, window_bounds = array<i64: 8, 128>}]} {
    %c0 = arith.constant 0 : index
    %c0_0 = arith.constant 0 : index
    %0 = vector.load %arg1[%c0, %c0_0] : memref<8x16xf32, #tpu.memory_space<vmem>>, vector<8x16xf32>
    %1 = math.cos %0 : vector<8x16xf32>
    %c0_1 = arith.constant 0 : index
    %c0_2 = arith.constant 0 : index
    %2 = vector.load %arg2[%c0_1, %c0_2] : memref<16x128xf32, #tpu.memory_space<vmem>>, vector<16x128xf32>
    %cst = arith.constant dense<0.000000e+00> : vector<8x128xf32>
    %3 = tpu.matmul %1, %2, %cst {dimension_numbers = #tpu.dot_dimension_numbers<[1], [0], [0], [1], [0, 0, 1, 1], [], []>, precision = #tpu.contract_precision<fp32>} : vector<8x16xf32>, vector<16x128xf32>, vector<8x128xf32> -> vector<8x128xf32>
    %c0_3 = arith.constant 0 : index
    %4 = memref.load %arg3[%c0_3] : memref<1xf32, #tpu.memory_space<smem>>
    %5 = vector.broadcast %4 : f32 to vector<8x128xf32>
    %6 = arith.addf %3, %5 : vector<8x128xf32>
    %7 = math.tanh %6 : vector<8x128xf32>
    %c0_4 = arith.constant 0 : index
    %c0_5 = arith.constant 0 : index
    %8 = vector.load %arg4[%c0_4, %c0_5] : memref<8x128xf32, #tpu.memory_space<vmem>>, vector<8x128xf32>
    tpu.vector_store %arg4[%c0_4, %c0_5], %7 {strides = array<i32>} : memref<8x128xf32, #tpu.memory_space<vmem>>, vector<8x128xf32>,
    return
  }
  func.func @transform_0(%arg0: i32) -> (i32, i32) {
    %c0_i32 = arith.constant 0 : i32
    %c0_i32_0 = arith.constant 0 : i32
    return %arg0, %c0_i32 : i32, i32
  }
  func.func @transform_1(%arg0: i32) -> (i32, i32) {
    %c0_i32 = arith.constant 0 : i32
    %c0_i32_0 = arith.constant 0 : i32
    %c0_i32_1 = arith.constant 0 : i32
    return %c0_i32, %c0_i32_0 : i32, i32
  }
  func.func @transform_2(%arg0: i32) -> i32 {
    %c0_i32 = arith.constant 0 : i32
    %c0_i32_0 = arith.constant 0 : i32
    return %c0_i32 : i32
  }
  func.func @transform_3(%arg0: i32) -> (i32, i32) {
    %c0_i32 = arith.constant 0 : i32
    %c0_i32_0 = arith.constant 0 : i32
    return %arg0, %c0_i32 : i32, i32
  }
}

</mosaic_0001>

<bundles_post_ra>
// kernel: _forward_impl.1
= control target key start
LH: loop header
LB: loop body
LE: loop exit
PB: predicated region body
PF: predicated region fallthrough
CT: control target
= control target key end

     0   :  { %v703_v0 = vmov 0.0|0.0   ;;  %vm704_vm0 = vmmov 0   ;;  %v705_v6 = vmov 0.0   ;;  %v706_v30 = vmov 683565275   ;;  %s810_s1 = inlined_call_operand.vmem [shape: f32[16,128], index: 1, kind: input, shape index: {}]   ;;  %s811_s0 = inlined_call_operand.vmem [shape: f32[8,16], index: 0, kind: input, shape index: {}]   ;;  %s812_s2 = inlined_call_operand.<no memory space> [shape: f32[1], index: 2, kind: input, shape index: {}]   ;;  %s813_s3 = inlined_call_operand.vmem [shape: f32[8,128], index: 3, kind: output, shape index: {}]  }
   0x1   :  { %665 = vmatprep.subr.bf16.mxu0 %v703_v0  ;;  %v119_v1 = vld [vmem:[%s810_s1] sm:$0xff]  ;;  %v120_v2 = vld [vmem:[%s810_s1 + $0x8] sm:$0xff]  ;;  %656 = vmatprep.subr.bf16.mxu1 %v703_v0  ;;  %v707_v32 = vmov 2475754826   ;;  %v708_v34 = vmov 2131351028  }
   0x2   :  { %v743_v3 = vld [vmem:[%s811_s0] sm:$0xff]  ;;  %v128_v4 = vand.u32 4294901760, %v119_v1  ;;  %v131_v5 = vand.u32 4294901760, %v120_v2  ;;  %639 = vmatprep.mubr.msk.f32.mxu0 %vm704_vm0, %v705_v6  ;;  %618 = vmatprep.mubr.msk.f32.mxu1 %vm704_vm0, %v705_v6  ;;  %v709_v36 = vmov 2102212464   ;;  %vm123_vm14 = vcmask 130048  }
   0x3   :  { %v19_v7 = vand.u32 2139095040, %v743_v3  ;;  %v16_v12 = vand.u32 2147483647, %v743_v3  ;;  %v710_v38 = vmov 920167782   ;;  %vm18_vm8 = vcmp.lt.s32.totalorder %v743_v3, 0 }
   0x4   :  { %v750_v8 = vpack.c.bf16 %v131_v5, %v128_v4  ;;  %v752_v9 = vsub.f32 %v119_v1, %v128_v4  ;;  %v754_v10 = vsub.f32 %v120_v2, %v131_v5  ;;  %v711_v45 = vmov 1326507024  }
   0x5   :  { %v20_v11 = vshrl.u32 %v19_v7, 23  ;;  %v23_v21 = vand.u32 8388607, %v16_v12  ;;  %vm17_vm9 = vcmp.le.f32.partialorder %v16_v12, 0.7853982  ;;  %vm108_vm13 = vweird.f32 %v743_v3 }
   0x6   :  { %667 = vmatpush3.bf16.msra.mxu0 %v750_v8  ;;  %658 = vmatpush3.bf16.msra.mxu1 %v750_v8  ;;  %v207_v13 = vand.u32 4294901760, %v752_v9  ;;  %v214_v14 = vand.u32 4294901760, %v754_v10  ;;  %v663_v15 = vpack.c.bf16 %v754_v10, %v752_v9 }
   0x7   :  { %v592_v16 = vadd.s32 4294967169, %v20_v11  ;;  %659 = vmatprep.subr.bf16.mxu1 %v703_v0  ;;  %668 = vmatprep.subr.bf16.mxu0 %v703_v0  ;;  %v24_v27 = vor.u32 8388608, %v23_v21 }
   0x8   :  { %v208_v17 = vsub.f32 %v752_v9, %v207_v13  ;;  %v215_v18 = vsub.f32 %v754_v10, %v214_v14  ;;  %v767_v19 = vpack.c.bf16 %v214_v14, %v207_v13 }
   0x9   :  { %v26_v20 = vadd.s32 1, %v592_v16  ;;  %v64_v47 = vshll.u32 %v24_v27, 8 }
   0xa   :  { %v209_v22 = vand.u32 4294901760, %v208_v17  ;;  %v216_v23 = vand.u32 4294901760, %v215_v18 }
   0xb   :  { %vm27_vm1 = vcmp.gt.s32.totalorder %v26_v20, 0 }
   0xc   :  { %v28_v24 = vsel %vm27_vm1, %v26_v20, 0  ;;  %v771_v25 = vpack.c.bf16 %v216_v23, %v209_v22 }
   0xd   :  { %v30_v26 = vand.u32 31, %v28_v24  ;;  %v29_v28 = vshrl.u32 %v28_v24, 5 }
   0xf   :  { %v31_v29 = vsub.s32 32, %v30_v26  ;;  %v33_v31 = vshll.u32 %v706_v30, %v30_v26  ;;  %v36_v33 = vshll.u32 %v707_v32, %v30_v26  ;;  %v39_v35 = vshll.u32 %v708_v34, %v30_v26 }
  0x10   :  { %v42_v37 = vshll.u32 %v709_v36, %v30_v26  ;;  %v45_v39 = vshll.u32 %v710_v38, %v30_v26  ;;  %vm48_vm2 = vcmp.lt.s32.totalorder %v29_v28, 1  ;;  %vm51_vm3 = vcmp.lt.s32.totalorder %v29_v28, 4 }
  0x11   :  { %v32_v40 = vshrl.u32 %v706_v30, %v31_v29  ;;  %v34_v41 = vshrl.u32 %v707_v32, %v31_v29  ;;  %v37_v42 = vshrl.u32 %v708_v34, %v31_v29  ;;  %v40_v43 = vshrl.u32 %v709_v36, %v31_v29 }
  0x12   :  { %v43_v44 = vshrl.u32 %v710_v38, %v31_v29  ;;  %v46_v46 = vshrl.u32 %v711_v45, %v31_v29  ;;  %vm49_vm4 = vcmp.lt.s32.totalorder %v29_v28, 2  ;;  %vm50_vm5 = vcmp.lt.s32.totalorder %v29_v28, 3 }
  0x13   :  { %v35_v48 = vor.u32 %v34_v41, %v33_v31  ;;  %v38_v49 = vor.u32 %v37_v42, %v36_v33  ;;  %v41_v50 = vor.u32 %v40_v43, %v39_v35 }
  0x14   :  { %v44_v51 = vor.u32 %v43_v44, %v42_v37  ;;  %v47_v52 = vor.u32 %v46_v46, %v45_v39 }
  0x15   :  { %v52_v53 = vsel %vm48_vm2, %v32_v40, %v35_v48  ;;  %v53_v54 = vsel %vm51_vm3, %v41_v50, 2102212464  ;;  %v56_v55 = vsel %vm48_vm2, %v35_v48, %v38_v49  ;;  %v60_v56 = vsel %vm48_vm2, %v38_v49, %v41_v50 }
  0x16   :  { %v54_v57 = vsel %vm50_vm5, %v38_v49, %v53_v54  ;;  %v57_v58 = vsel %vm51_vm3, %v44_v51, 920167782  ;;  %v61_v59 = vsel %vm51_vm3, %v47_v52, 1326507024 }
  0x17   :  { %v58_v60 = vsel %vm50_vm5, %v41_v50, %v57_v58  ;;  %v62_v61 = vsel %vm50_vm5, %v44_v51, %v61_v59  ;;  %v55_v62 = vsel %vm49_vm4, %v52_v53, %v54_v57 }
  0x18   :  { %v59_v63 = vsel %vm49_vm4, %v56_v55, %v58_v60  ;;  %v63_v1 = vsel %vm49_vm4, %v60_v56, %v62_v61  ;;  %v71_v11 = vmul.u32 %v64_v47, %v55_v62 }
  0x19   :  { %v773_v2 = vmul.u32.u64.low %v64_v47, %v63_v1  ;;  %v774_v4 = vmul.u32.u64.high %v64_v47, %v63_v1, %v773_v2  ;;  %v776_v5 = vmul.u32.u64.low %v64_v47, %v59_v63  ;;  %v777_v7 = vmul.u32.u64.high %v64_v47, %v59_v63, %v776_v5 }
  0x1b   :  { %vm73_vm6 = vc.u32 %v774_v4, %v776_v5  ;;  %v74_v13 = vadd.s32 1, %v777_v7  ;;  %v72_v27 = vadd.s32 %v776_v5, %v774_v4 }
  0x1d   :  { %v75_v14 = vsel %vm73_vm6, %v74_v13, %v777_v7 }
  0x1e   :  { %v76_v16 = vadd.s32 %v75_v14, %v71_v11 }
  0x20   :  { %v77_v17 = vadd.s32 536870912, %v76_v16 }
  0x22   :  { %v78_v18 = vshrl.u32 %v77_v17, 30 }
  0x24   :  { %v79_v20 = vshll.u32 %v78_v18, 30  ;;  %v102_v41 = vsub.s32 4, %v78_v18 }
  0x26   :  { %v80_v21 = vsub.s32 %v76_v16, %v79_v20  ;;  %v103_v44 = vsel %vm18_vm8, %v102_v41, %v78_v18 }
  0x27   :  { %v105_v45 = vsel %vm17_vm9, 0, %v103_v44 }
  0x28   :  { %v82_v22 = vsub.s32 0, %v80_v21  ;;  %v109_v46 = vand.u32 3, %v105_v45 }
  0x2a   :  { %v593_v23 = vmin.u32 %v82_v22, %v80_v21  ;;  %vm114_vm10 = vcmp.eq.s32.totalorder %v109_v46, 2  ;;  %vm111_vm11 = vcmp.eq.s32.totalorder %v109_v46, 0  ;;  %vm110_vm12 = vcmp.lt.s32.totalorder %v109_v46, 2 }
  0x2c   :  { %v84_v24 = vclz %v593_v23 }
  0x2e   :  { %v594_v26 = vadd.s32 4294967294, %v84_v24 }
  0x30   :  { %vm595_vm7 = vcmp.lt.s32.totalorder %v594_v26, 0 }
  0x31   :  { %v87_v28 = vsel %vm595_vm7, 0, %v594_v26 }
  0x32   :  { %v88_v29 = vsub.s32 32, %v87_v28  ;;  %v89_v30 = vshll.u32 %v80_v21, %v87_v28  ;;  %v92_v31 = vsub.s32 4294967266, %v87_v28 }
  0x34   :  { %v90_v32 = vshrl.u32 %v72_v27, %v88_v29  ;;  %v93_v33 = vadd.s32 127, %v92_v31 }
  0x36   :  { %v91_v34 = vor.u32 %v90_v32, %v89_v30  ;;  %v94_v35 = vshll.u32 %v93_v33, 23 }
  0x38   :  { %v95_v36 = vor.u32 4788187, %v94_v35  ;;  %v98_v37 = vcvt.s32.f32 %v91_v34 }
  0x3a   :  { %v96_v38 = vand.u32 2147483647, %v95_v36 }
  0x3c   :  { %v99_v39 = vmul.f32 %v98_v37, %v96_v38 }
  0x3e   :  { %v100_v40 = vxor.u32 2147483648, %v99_v39 }
  0x40   :  { %v101_v42 = vsel %vm18_vm8, %v100_v40, %v99_v39 }
  0x41   :  { %v104_v43 = vsel %vm17_vm9, %v743_v3, %v101_v42 }
  0x42   :  { %697 = vcosq.f32 %v104_v43 }
  0x43   :  { %699 = vsinq.f32 %v104_v43 }
  0x4c   :  { %v698_v47 = vpop.eup %697 }
  0x4d   :  { %v700_v48 = vpop.eup %699  ;;  %v115_v49 = vxor.u32 2147483648, %v698_v47 }
  0x4e   :  { %v112_v50 = vxor.u32 2147483648, %v700_v48 }
  0x4f   :  { %v116_v12 = vsel %vm114_vm10, %v115_v49, %v700_v48 }
  0x50   :  { %v113_v51 = vsel %vm111_vm11, %v698_v47, %v112_v50 }
  0x51   :  { %v117_v52 = vsel %vm110_vm12, %v113_v51, %v116_v12 }
  0x52   :  { %v118_v53 = vsel %vm108_vm13, nan, %v117_v52 }
  0x53   :  { %v125_v54 = vsel %vm123_vm14, %v118_v53, 0 }
  0x54   :  { %v194_v55 = vand.u32 4294901760, %v125_v54 }
  0x56   :  { %v195_v56 = vsub.f32 %v125_v54, %v194_v55 }
  0x58   :  { %v196_v57 = vand.u32 4294901760, %v195_v56 }
  0x5a   :  { %640 = vmatmul.mubr.f32.vlgmr.msra.gmra.mrb[0].mxu0 %v196_v57  ;;  %v197_v58 = vsub.f32 %v195_v56, %v196_v57 }
  0x5b   :  { %670 = vmatpush3.bf16.msra.mxu0 %v767_v19  ;;  %646 = vmatprep.mubr.msk.f32.mxu0 %vm704_vm0, %v705_v6 }
  0x5c   :  { %v198_v59 = vand.u32 4294901760, %v197_v58  ;;  %671 = vmatprep.subr.bf16.mxu0 %v703_v0 }
  0x5e   :  { %619 = vmatmul.mubr.f32.vlgmr.msra.gmra.mrb[0].mxu1 %v198_v59 }
  0x5f   :  { %661 = vmatpush3.bf16.msra.mxu1 %v771_v25  ;;  %625 = vmatprep.mubr.msk.f32.mxu1 %vm704_vm0, %v705_v6 }
  0x60   :  { %662 = vmatprep.subr.bf16.mxu1 %v703_v0  ;;  %v122_v0 = vstv %s812_s2 }
  0x62   :  { %647 = vmatmul.mubr.f32.vlgmr.msra.gmra.mrb[0].mxu0 %v194_v55 }
  0x63   :  { %673 = vmatpush3.bf16.msra.mxu0 %v750_v8  ;;  %653 = vmatprep.mubr.msk.f32.mxu0 %vm704_vm0, %v705_v6 }
  0x66   :  { %626 = vmatmul.mubr.f32.vlgmr.msra.gmra.mrb[0].mxu1 %v194_v55 }
  0x67   :  { %664 = vmatpush3.bf16.msra.mxu1 %v663_v15  ;;  %632 = vmatprep.mubr.msk.f32.mxu1 %vm704_vm0, %v705_v6 }
  0x6a   :  { %654 = vmatmul.mubr.f32.vlgmr.msra.gmra.mrb[0].mxu0 %v194_v55 }
  0x6e   :  { %633 = vmatmul.mubr.f32.vlgmr.msra.gmra.mrb[0].mxu1 %v195_v56 }
 0x13d   :  { %v582_v3 = vpop.f32.mrb[0].mxu0 }
 0x13e   :  { %v655_v19 = vpop.f32.mrb[1].mxu0 }
 0x141   :  { %v357_v8 = vpop.f32.mrb[0].mxu1 }
 0x142   :  { %v674_v25 = vadd.f32 %v357_v8, %v122_v0  ;;  %v634_v60 = vpop.f32.mrb[1].mxu1 }
 0x144   :  { %v675_v61 = vadd.f32 %v674_v25, %v582_v3 }
 0x146   :  { %701 = vtanh.f32 %v675_v61 }
 0x150   :  { %v702_v62 = vpop.eup %701 }
 0x151   :  { %587 = vst [vmem:[%s813_s3] sm:$0xff] %v702_v62 }

</bundles_post_ra>
